<compile_context>
chip_gen: v7x
topology: tpu7x:2x2x1
jax: 0.10.0
libtpu: 0.0.40
codegen_flags: <defaults>
</compile_context>

<pallas_src>
import functools

import jax
import jax.numpy as jnp
from jax.experimental import pallas as pl
from jax.experimental.pallas import tpu as pltpu


def _gcn_tile_kernel(a_ref, xw_ref, bg_ref, w1_ref, b1_ref, w2_ref, b2_ref, out_ref,
                     *, nodes_per_graph):
    """One grid step = one tile of GT graphs packed block-diagonally (NT = GT*N node rows)."""
    # GraphConv aggregation: A_hat @ (X Wg). bf16 inputs, f32 accumulation on the MXU.
    h = jnp.dot(a_ref[...], xw_ref[...], preferred_element_type=jnp.float32)   # [NT, hidden]
    h = jnp.maximum(h + bg_ref[...], 0.0)

    # dgl.mean_nodes: per-graph mean == sublane-group reduction (N == 8 rows per graph).
    # Runs on the XLU (overlaps MXU work); no pooling matmul / pooling input needed.
    nt, hidden = h.shape
    gt = nt // nodes_per_graph
    hg = h.reshape(gt, nodes_per_graph, hidden).sum(axis=1) * (1.0 / nodes_per_graph)  # [GT, hidden]

    # MLP head, batched over the tile's GT graphs (f32).
    z = jnp.maximum(
        jnp.dot(hg, w1_ref[...], preferred_element_type=jnp.float32) + b1_ref[...], 0.0)
    out_ref[...] = (
        jnp.dot(z, w2_ref[...], preferred_element_type=jnp.float32) + b2_ref[...])  # [GT, C_PAD]


@functools.partial(jax.jit, static_argnames=("nodes_per_graph", "graphs_per_tile", "n_classes"))
def gcn_classifier_forward(a_blocks, x_nodes, wg, bg, w1, b1, w2, b2,
                           *, nodes_per_graph, graphs_per_tile, n_classes):
    """a_blocks: [T, NT, NT] block-diag normalized adjacency; x_nodes: [T*NT, in_dim].
    Returns logits [T*graphs_per_tile, n_classes]."""
    num_tiles, nt, _ = a_blocks.shape
    hidden = wg.shape[1]
    num_graphs = num_tiles * graphs_per_tile
    lane = 128

    # Fold Wg in the wrapper (one dense XLA matmul over all nodes), feed bf16 tiles to the kernel.
    xwg = (x_nodes.astype(jnp.float32) @ wg).astype(jnp.bfloat16)      # [T*NT, hidden]
    a_bf16 = a_blocks.astype(jnp.bfloat16)

    # Lane-dense output slab: pad class dim to a multiple of 128, slice back afterwards.
    c_pad = ((n_classes + lane - 1) // lane) * lane
    w2p = jnp.zeros((hidden, c_pad), jnp.float32).at[:, :n_classes].set(w2)
    b2p = jnp.zeros((1, c_pad), jnp.float32).at[:, :n_classes].set(b2)

    kernel = functools.partial(_gcn_tile_kernel, nodes_per_graph=nodes_per_graph)

    out = pl.pallas_call(
        kernel,
        out_shape=jax.ShapeDtypeStruct((num_graphs, c_pad), jnp.float32),
        grid=(num_tiles,),
        in_specs=[
            # Per-tile tensors: one block per grid step (leading size-1 dim squeezed).
            pl.BlockSpec((None, nt, nt), lambda t: (t, 0, 0)),   # block-diag adjacency (bf16)
            pl.BlockSpec((nt, hidden), lambda t: (t, 0)),        # XWg rows of this tile (bf16)
            # Parameters: constant block index -> DMA'd once, VMEM-resident across the grid.
            pl.BlockSpec(bg.shape, lambda t: (0, 0)),
            pl.BlockSpec(w1.shape, lambda t: (0, 0)),
            pl.BlockSpec(b1.shape, lambda t: (0, 0)),
            pl.BlockSpec(w2p.shape, lambda t: (0, 0)),
            pl.BlockSpec(b2p.shape, lambda t: (0, 0)),
        ],
        out_specs=pl.BlockSpec((graphs_per_tile, c_pad), lambda t: (t, 0)),
        compiler_params=pltpu.CompilerParams(
            dimension_semantics=("parallel",)),   # tiles independent -> megacore split on v7x
    )(a_bf16, xwg, bg, w1, b1, w2p, b2p)

    return out[:, :n_classes]


def build_normalized_adjacency(adj):
    """A_hat = D^{-1/2} (A + I) D^{-1/2}, degrees computed after self-loop insertion."""
    n = adj.shape[0]
    a = adj + jnp.eye(n, dtype=adj.dtype)
    deg = jnp.sum(a, axis=1)
    d_inv_sqrt = jnp.where(deg > 0, 1.0 / jnp.sqrt(deg), 0.0)
    return a * d_inv_sqrt[:, None] * d_inv_sqrt[None, :]


if __name__ == "__main__":
    # Module-consistent shapes; tile sized to fill the 256x256 MXU and give >=4 grid steps per core.
    N = 8               # nodes per graph (== sublane count -> pooling is a sublane reduction)
    in_dim = 16
    hidden_dim = 32
    n_classes = 4
    GT = 32             # graphs per tile -> NT = 256 node rows per grid step
    num_tiles = 8       # grid steps (4 per TensorCore on v7x)
    B = GT * num_tiles  # 256 graphs in the batch
    NT = GT * N

    key = jax.random.PRNGKey(0)
    k_x, k_adj, k_wg, k_bg, k_w1, k_b1, k_w2, k_b2 = jax.random.split(key, 8)

    # Node features (g.ndata['m'].float()) for every graph.
    x = jax.random.normal(k_x, (B, N, in_dim), dtype=jnp.float32)

    # Deterministic random undirected graphs, then symmetric normalization with self-loops.
    raw = jax.random.uniform(k_adj, (B, N, N)) < 0.4
    adj = jnp.triu(raw.astype(jnp.float32), k=1)
    adj = adj + jnp.swapaxes(adj, 1, 2)
    a_hat = jax.vmap(build_normalized_adjacency)(adj)                   # [B, N, N]

    # Vectorized block-diagonal packing of GT graphs per tile (== dgl.batch of the tile's graphs).
    a_hat_t = a_hat.reshape(num_tiles, GT, N, N)
    eye_gt = jnp.eye(GT, dtype=jnp.float32)
    a_blocks = jnp.einsum('tgij,gk->tgikj', a_hat_t, eye_gt).reshape(num_tiles, NT, NT)

    # Stack node features of all graphs: [B*N, in_dim] = [num_tiles*NT, in_dim].
    x_nodes = x.reshape(B * N, in_dim)

    # Deterministic parameter init (GraphConv(in,hid), Linear(hid,hid), Linear(hid,ncls)).
    wg = jax.random.normal(k_wg, (in_dim, hidden_dim), dtype=jnp.float32) * 0.1
    bg = jax.random.normal(k_bg, (1, hidden_dim), dtype=jnp.float32) * 0.1
    w1 = jax.random.normal(k_w1, (hidden_dim, hidden_dim), dtype=jnp.float32) * 0.1
    b1 = jax.random.normal(k_b1, (1, hidden_dim), dtype=jnp.float32) * 0.1
    w2 = jax.random.normal(k_w2, (hidden_dim, n_classes), dtype=jnp.float32) * 0.1
    b2 = jax.random.normal(k_b2, (1, n_classes), dtype=jnp.float32) * 0.1

    out = gcn_classifier_forward(a_blocks, x_nodes, wg, bg, w1, b1, w2, b2,
                                 nodes_per_graph=N, graphs_per_tile=GT, n_classes=n_classes)
    out = jax.block_until_ready(out)

    # Pure-JAX f32 per-graph reference of the same math.
    h_ref = jnp.maximum(jnp.einsum('bij,bjd->bid', a_hat, x @ wg) + bg, 0.0)   # [B, N, hidden]
    hg_ref = jnp.mean(h_ref, axis=1)                                           # [B, hidden]
    z_ref = jnp.maximum(hg_ref @ w1 + b1, 0.0)
    ref = z_ref @ w2 + b2                                                      # [B, n_classes]

    assert out.shape == (B, n_classes)
    # bf16 adjacency / XWg kernel inputs -> relaxed tolerance vs the f32 reference.
    assert jnp.allclose(out, ref, atol=2e-2, rtol=2e-2), (
        "Pallas output mismatch vs reference; max abs err = "
        f"{float(jnp.max(jnp.abs(out - ref)))}")

    print("KERNEL_OK")
</pallas_src>

<mosaic_0001>
module attributes {stable_mosaic.version = 11 : i64} {
  func.func @_gcn_tile_kernel(%arg0: i32, %arg1: memref<1x256x256xbf16, #tpu.memory_space<vmem>>, %arg2: memref<256x32xbf16, #tpu.memory_space<vmem>>, %arg3: memref<1x32xf32, #tpu.memory_space<vmem>>, %arg4: memref<32x32xf32, #tpu.memory_space<vmem>>, %arg5: memref<1x32xf32, #tpu.memory_space<vmem>>, %arg6: memref<32x128xf32, #tpu.memory_space<vmem>>, %arg7: memref<1x128xf32, #tpu.memory_space<vmem>>, %arg8: memref<32x128xf32, #tpu.memory_space<vmem>>) attributes {dimension_semantics = [#tpu.dimension_semantics<parallel>], iteration_bounds = array<i64: 8>, scalar_prefetch = 0 : i64, scratch_operands = 0 : i64, tpu.core_type = #tpu.core_type<tc>, window_params = [{transform_indices = @transform_0, window_bounds = array<i64: 1, 256, 256>}, {transform_indices = @transform_1, window_bounds = array<i64: 256, 32>}, {pipeline_mode = #tpu.pipeline_mode<synchronous>, transform_indices = @transform_2, window_bounds = array<i64: 1, 32>}, {pipeline_mode = #tpu.pipeline_mode<synchronous>, transform_indices = @transform_3, window_bounds = array<i64: 32, 32>}, {pipeline_mode = #tpu.pipeline_mode<synchronous>, transform_indices = @transform_4, window_bounds = array<i64: 1, 32>}, {pipeline_mode = #tpu.pipeline_mode<synchronous>, transform_indices = @transform_5, window_bounds = array<i64: 32, 128>}, {pipeline_mode = #tpu.pipeline_mode<synchronous>, transform_indices = @transform_6, window_bounds = array<i64: 1, 128>}, {transform_indices = @transform_7, window_bounds = array<i64: 32, 128>}]} {
    %c0 = arith.constant 0 : index
    %c0_0 = arith.constant 0 : index
    %c0_1 = arith.constant 0 : index
    %0 = vector.load %arg1[%c0, %c0_0, %c0_1] : memref<1x256x256xbf16, #tpu.memory_space<vmem>>, vector<1x256x256xbf16>
    %1 = vector.shape_cast %0 : vector<1x256x256xbf16> to vector<256x256xbf16>
    %c0_2 = arith.constant 0 : index
    %c0_3 = arith.constant 0 : index
    %2 = vector.load %arg2[%c0_2, %c0_3] : memref<256x32xbf16, #tpu.memory_space<vmem>>, vector<256x32xbf16>
    %cst = arith.constant dense<0.000000e+00> : vector<256x32xf32>
    %3 = tpu.matmul %1, %2, %cst {dimension_numbers = #tpu.dot_dimension_numbers<[1], [0], [0], [1], [0, 0, 1, 1], [], []>} : vector<256x256xbf16>, vector<256x32xbf16>, vector<256x32xf32> -> vector<256x32xf32>
    %c0_4 = arith.constant 0 : index
    %c0_5 = arith.constant 0 : index
    %4 = vector.load %arg3[%c0_4, %c0_5] : memref<1x32xf32, #tpu.memory_space<vmem>>, vector<1x32xf32>
    %5 = vector.broadcast %4 : vector<1x32xf32> to vector<256x32xf32>
    %6 = arith.addf %3, %5 : vector<256x32xf32>
    %cst_6 = arith.constant 0.000000e+00 : f32
    %7 = vector.broadcast %cst_6 : f32 to vector<256x32xf32>
    %8 = arith.maximumf %6, %7 : vector<256x32xf32>
    %9 = vector.shape_cast %8 : vector<256x32xf32> to vector<32x8x32xf32>
    %cst_7 = arith.constant dense<0.000000e+00> : vector<32x32xf32>
    %10 = vector.multi_reduction <add>, %9, %cst_7 [1] : vector<32x8x32xf32> to vector<32x32xf32>
    %cst_8 = arith.constant 1.250000e-01 : f32
    %11 = vector.broadcast %cst_8 : f32 to vector<32x32xf32>
    %12 = arith.mulf %10, %11 : vector<32x32xf32>
    %c0_9 = arith.constant 0 : index
    %c0_10 = arith.constant 0 : index
    %13 = vector.load %arg4[%c0_9, %c0_10] : memref<32x32xf32, #tpu.memory_space<vmem>>, vector<32x32xf32>
    %cst_11 = arith.constant dense<0.000000e+00> : vector<32x32xf32>
    %14 = tpu.matmul %12, %13, %cst_11 {dimension_numbers = #tpu.dot_dimension_numbers<[1], [0], [0], [1], [0, 0, 1, 1], [], []>} : vector<32x32xf32>, vector<32x32xf32>, vector<32x32xf32> -> vector<32x32xf32>
    %c0_12 = arith.constant 0 : index
    %c0_13 = arith.constant 0 : index
    %15 = vector.load %arg5[%c0_12, %c0_13] : memref<1x32xf32, #tpu.memory_space<vmem>>, vector<1x32xf32>
    %16 = vector.broadcast %15 : vector<1x32xf32> to vector<32x32xf32>
    %17 = arith.addf %14, %16 : vector<32x32xf32>
    %cst_14 = arith.constant 0.000000e+00 : f32
    %18 = vector.broadcast %cst_14 : f32 to vector<32x32xf32>
    %19 = arith.maximumf %17, %18 : vector<32x32xf32>
    %c0_15 = arith.constant 0 : index
    %c0_16 = arith.constant 0 : index
    %20 = vector.load %arg6[%c0_15, %c0_16] : memref<32x128xf32, #tpu.memory_space<vmem>>, vector<32x128xf32>
    %cst_17 = arith.constant dense<0.000000e+00> : vector<32x128xf32>
    %21 = tpu.matmul %19, %20, %cst_17 {dimension_numbers = #tpu.dot_dimension_numbers<[1], [0], [0], [1], [0, 0, 1, 1], [], []>} : vector<32x32xf32>, vector<32x128xf32>, vector<32x128xf32> -> vector<32x128xf32>
    %c0_18 = arith.constant 0 : index
    %c0_19 = arith.constant 0 : index
    %22 = vector.load %arg7[%c0_18, %c0_19] : memref<1x128xf32, #tpu.memory_space<vmem>>, vector<1x128xf32>
    %23 = vector.broadcast %22 : vector<1x128xf32> to vector<32x128xf32>
    %24 = arith.addf %21, %23 : vector<32x128xf32>
    %c0_20 = arith.constant 0 : index
    %c0_21 = arith.constant 0 : index
    %25 = vector.load %arg8[%c0_20, %c0_21] : memref<32x128xf32, #tpu.memory_space<vmem>>, vector<32x128xf32>
    tpu.vector_store %arg8[%c0_20, %c0_21], %24 {strides = array<i32>} : memref<32x128xf32, #tpu.memory_space<vmem>>, vector<32x128xf32>,
    return
  }
  func.func @transform_0(%arg0: i32) -> (i32, i32, i32) {
    %c0_i32 = arith.constant 0 : i32
    %c0_i32_0 = arith.constant 0 : i32
    %c0_i32_1 = arith.constant 0 : i32
    return %arg0, %c0_i32, %c0_i32_0 : i32, i32, i32
  }
  func.func @transform_1(%arg0: i32) -> (i32, i32) {
    %c0_i32 = arith.constant 0 : i32
    %c0_i32_0 = arith.constant 0 : i32
    return %arg0, %c0_i32 : i32, i32
  }
  func.func @transform_2(%arg0: i32) -> (i32, i32) {
    %c0_i32 = arith.constant 0 : i32
    %c0_i32_0 = arith.constant 0 : i32
    %c0_i32_1 = arith.constant 0 : i32
    return %c0_i32, %c0_i32_0 : i32, i32
  }
  func.func @transform_3(%arg0: i32) -> (i32, i32) {
    %c0_i32 = arith.constant 0 : i32
    %c0_i32_0 = arith.constant 0 : i32
    %c0_i32_1 = arith.constant 0 : i32
    return %c0_i32, %c0_i32_0 : i32, i32
  }
  func.func @transform_4(%arg0: i32) -> (i32, i32) {
    %c0_i32 = arith.constant 0 : i32
    %c0_i32_0 = arith.constant 0 : i32
    %c0_i32_1 = arith.constant 0 : i32
    return %c0_i32, %c0_i32_0 : i32, i32
  }
  func.func @transform_5(%arg0: i32) -> (i32, i32) {
    %c0_i32 = arith.constant 0 : i32
    %c0_i32_0 = arith.constant 0 : i32
    %c0_i32_1 = arith.constant 0 : i32
    return %c0_i32, %c0_i32_0 : i32, i32
  }
  func.func @transform_6(%arg0: i32) -> (i32, i32) {
    %c0_i32 = arith.constant 0 : i32
    %c0_i32_0 = arith.constant 0 : i32
    %c0_i32_1 = arith.constant 0 : i32
    return %c0_i32, %c0_i32_0 : i32, i32
  }
  func.func @transform_7(%arg0: i32) -> (i32, i32) {
    %c0_i32 = arith.constant 0 : i32
    %c0_i32_0 = arith.constant 0 : i32
    return %arg0, %c0_i32 : i32, i32
  }
}

</mosaic_0001>

<bundles_post_ra>
// kernel: gcn_classifier_forward.1
= control target key start
LH: loop header
LB: loop body
LE: loop exit
PB: predicated region body
PF: predicated region fallthrough
CT: control target
= control target key end

     0   :  { %s1816_s24 = smov 0   ;;  %s2197_s0 = inlined_call_operand.vmem [shape: bf16[8,256,256], index: 0, kind: input, shape index: {}]   ;;  %s2198_s1 = inlined_call_operand.vmem [shape: bf16[2048,32], index: 1, kind: input, shape index: {}]   ;;  %s2199_s2 = inlined_call_operand.vmem [shape: f32[1,32], index: 2, kind: input, shape index: {}]   ;;  %s2200_s3 = inlined_call_operand.vmem [shape: f32[32,32], index: 3, kind: input, shape index: {}]   ;;  %s2201_s4 = inlined_call_operand.vmem [shape: f32[1,32], index: 4, kind: input, shape index: {}]   ;;  %s2202_s5 = inlined_call_operand.vmem [shape: f32[32,128], index: 5, kind: input, shape index: {}]   ;;  %s2203_s6 = inlined_call_operand.vmem [shape: f32[1,128], index: 6, kind: input, shape index: {}]   ;;  %s2204_s7 = inlined_call_operand.vmem [shape: f32[256,128], index: 7, kind: output, shape index: {}]  }
   0x1 LB: > { %s1822_s25 = sadd.s32 4294967295, %s1774_s24   ;;  %p1439_p0 = scmp.ge.s32.totalorder %s1774_s24, 1  ;;  %s1774_s24 = sphi %s1816_s24, %s17_s24  }
   0x2   : > { %p248_p1 = scmp.lt.s32.totalorder %s1774_s24, 9 }
   0x4   : > { %p249_p2 = pnand %p1439_p0, %p248_p1 }
   0x5   : > { %s1442_s26 = sshll.u32 (!%p249_p2), %s1822_s25, 5  ;;  %p285_p3 = scmp.lt.s32.totalorder (!%p249_p2), %s1822_s25, 7  ;;  %v1080_v48 = vld [vmem:[%s2200_s3] sm:$0xff] (!%p249_p2)  ;;  %v1081_v49 = vld [vmem:[%s2200_s3 + $0x8] sm:$0xff] (!%p249_p2)  ;;  %v1082_v51 = vld [vmem:[%s2200_s3 + $0x10] sm:$0xff] (!%p249_p2)  ;;  %vm823_vm0 = vcmask (!%p249_p2), 261120  }
   0x6   : > { %252 = sbr.rel (%p249_p2) target bundleno = 804 (0x324), region = 48  ;;  %p291_p4 = scmp.lt.s32.totalorder (!%p249_p2), %s1442_s26, 255  ;;  %v1664_v50 = vpack.c.bf16 (!%p249_p2), %v1081_v49, %v1080_v48  ;;  %v1083_v52 = vld [vmem:[%s2200_s3 + $0x18] sm:$0xff] (!%p249_p2)  ;;  %v1255_v54 = vld [vmem:[%s2202_s5] sm:$0xff] (!%p249_p2)  ;;  %v1256_v55 = vld [vmem:[%s2202_s5 + $0x8] sm:$0xff] (!%p249_p2)  ;;  %vm1123_vm1 = vcmask (!%p249_p2), 1041409  }
   0x7   : > { %v1668_v53 = vpack.c.bf16 (!%p249_p2), %v1083_v52, %v1082_v51  ;;  %v1905_v56 = vpack.c.bf16 (!%p249_p2), %v1256_v55, %v1255_v54  ;;  %v1911_v59 = vld [vmem:[%s2199_s2] ss:$0 sm:$0xff] (!%p249_p2)  ;;  %vm1125_vm2 = vcmask (!%p249_p2), 1042434   ;;  %vm1127_vm3 = vcmask (!%p249_p2), 1043459  }
   0x8   : > { %vm1129_vm4 = vcmask (!%p249_p2), 1044484   ;;  %vm1131_vm5 = vcmask (!%p249_p2), 1045509   ;;  %vm1133_vm6 = vcmask (!%p249_p2), 1046534   ;;  %vm1135_vm7 = vcmask (!%p249_p2), 1047559  }
   0xd   : > { %s286_s27 = scalar_select %p285_p3, %s1822_s25, 7 }
   0xe   : > { %s2206_s26 = smov (!%p291_p4, %s1442_s26), 255 }
   0xf   : > { %s1507_s28 = sshll.u32 %s286_s27, 8  ;;  %s1443_s29 = sshll.u32 %s2206_s26, 2 }
  0x10   : > { %s1832_s9 = scalar_lea.vmem %s2197_s0, %s1507_s28  ;;  %s1837_s12 = scalar_lea.vmem %s2198_s1, %s1443_s29 }
  0x11   : > { %v1704_v0 = vld [vmem:[%s1837_s12 + $0x40] sm:$0xff]   ;;  %v1706_v2 = vld [vmem:[%s1837_s12 + $0x48] sm:$0xff]   ;;  %v1708_v4 = vld [vmem:[%s1837_s12 + $0x50] sm:$0xff]  }
  0x12   : > { %v1705_v1 = vld [vmem:[%s1837_s12] sm:$0xff]   ;;  %1508 = vmatprep.subr.bf16.mxu0 %v1704_v0  ;;  %1680 = vmatprep.subr.bf16.mxu1 %v1704_v0  ;;  %v1707_v3 = vld [vmem:[%s1837_s12 + $0x8] sm:$0xff]   ;;  %v1709_v5 = vld [vmem:[%s1837_s12 + $0x10] sm:$0xff]  }
  0x13   : > { %1509 = vmatpush3.bf16.msra.mxu0 %v1705_v1  ;;  %1688 = vmatpush3.bf16.msra.mxu1 %v1705_v1  ;;  %v1710_v6 = vld [vmem:[%s1837_s12 + $0x58] sm:$0xff]   ;;  %v1712_v8 = vld [vmem:[%s1837_s12 + $0x60] sm:$0xff]   ;;  %v1714_v10 = vld [vmem:[%s1837_s12 + $0x68] sm:$0xff]  }
  0x14   : > { %1510 = vmatprep.subr.bf16.mxu0 %v1706_v2  ;;  %1681 = vmatprep.subr.bf16.mxu1 %v1706_v2  ;;  %v1711_v7 = vld [vmem:[%s1837_s12 + $0x18] sm:$0xff]   ;;  %v1713_v9 = vld [vmem:[%s1837_s12 + $0x20] sm:$0xff]   ;;  %v1715_v13 = vld [vmem:[%s1837_s12 + $0x28] sm:$0xff]  }
  0x15   : > { %v1722_v11 = vld [vmem:[%s1832_s9 + $0x4] ss:$8 sps:$4 sm:$0xff]   ;;  %v1725_v12 = vld [vmem:[%s1832_s9 + $0x94] ss:$8 sps:$4 sm:$0xff]   ;;  %v1720_v18 = vld [vmem:[%s1832_s9] ss:$8 sps:$4 sm:$0xff]  }
  0x16   : > { %662 = vmatprep.mubr.bf16.mxu0 %v1722_v11  ;;  %v1716_v14 = vld [vmem:[%s1837_s12 + $0x70] sm:$0xff]   ;;  %734 = vmatprep.mubr.bf16.mxu1 %v1725_v12  ;;  %v1718_v16 = vld [vmem:[%s1837_s12 + $0x78] sm:$0xff]   ;;  %v1728_v21 = vld [vmem:[%s1832_s9 + $0xa4] ss:$8 sps:$4 sm:$0xff]  }
  0x17   : > { %1511 = vmatpush3.bf16.msra.mxu0 %v1707_v3  ;;  %1689 = vmatpush3.bf16.msra.mxu1 %v1707_v3  ;;  %v1717_v15 = vld [vmem:[%s1837_s12 + $0x30] sm:$0xff]   ;;  %v1719_v17 = vld [vmem:[%s1837_s12 + $0x38] sm:$0xff]   ;;  %v1731_v23 = vld [vmem:[%s1832_s9 + $0xa0] ss:$8 sps:$4 sm:$0xff]   ;;  %s1444_s12 = sshll.u32 %s1822_s25, 2 }
  0x18   : > { %1512 = vmatprep.subr.bf16.mxu0 %v1708_v4  ;;  %1682 = vmatprep.subr.bf16.mxu1 %v1708_v4  ;;  %v1723_v19 = vld [vmem:[%s1832_s9 + $0x90] ss:$8 sps:$4 sm:$0xff]   ;;  %v1726_v20 = vld [vmem:[%s1832_s9 + $0x14] ss:$8 sps:$4 sm:$0xff]   ;;  %v1732_v24 = vld [vmem:[%s1832_s9 + $0x24] ss:$8 sps:$4 sm:$0xff]  }
  0x19   : > { %v1730_v22 = vld [vmem:[%s1832_s9 + $0x10] ss:$8 sps:$4 sm:$0xff]   ;;  %v1734_v25 = vld [vmem:[%s1832_s9 + $0xb4] ss:$8 sps:$4 sm:$0xff]   ;;  %v1736_v26 = vld [vmem:[%s1832_s9 + $0x20] ss:$8 sps:$4 sm:$0xff]  }
  0x1a   : > { %v1737_v27 = vld [vmem:[%s1832_s9 + $0xb0] ss:$8 sps:$4 sm:$0xff]   ;;  %v1738_v28 = vld [vmem:[%s1832_s9 + $0x34] ss:$8 sps:$4 sm:$0xff]   ;;  %v1740_v29 = vld [vmem:[%s1832_s9 + $0xc4] ss:$8 sps:$4 sm:$0xff]  }
  0x1b   : > { %1513 = vmatpush3.bf16.msra.mxu0 %v1709_v5  ;;  %1690 = vmatpush3.bf16.msra.mxu1 %v1709_v5  ;;  %v1742_v30 = vld [vmem:[%s1832_s9 + $0x30] ss:$8 sps:$4 sm:$0xff]   ;;  %v1743_v31 = vld [vmem:[%s1832_s9 + $0xc0] ss:$8 sps:$4 sm:$0xff]   ;;  %v1744_v32 = vld [vmem:[%s1832_s9 + $0x44] ss:$8 sps:$4 sm:$0xff]  }
  0x1c   : > { %1514 = vmatprep.subr.bf16.mxu0 %v1710_v6  ;;  %1683 = vmatprep.subr.bf16.mxu1 %v1710_v6  ;;  %v1746_v33 = vld [vmem:[%s1832_s9 + $0xd4] ss:$8 sps:$4 sm:$0xff]   ;;  %v1748_v34 = vld [vmem:[%s1832_s9 + $0x40] ss:$8 sps:$4 sm:$0xff]   ;;  %v1749_v35 = vld [vmem:[%s1832_s9 + $0xd0] ss:$8 sps:$4 sm:$0xff]  }
  0x1d   : > { %v1750_v36 = vld [vmem:[%s1832_s9 + $0x54] ss:$8 sps:$4 sm:$0xff]   ;;  %v1752_v37 = vld [vmem:[%s1832_s9 + $0xe4] ss:$8 sps:$4 sm:$0xff]   ;;  %v1754_v38 = vld [vmem:[%s1832_s9 + $0x50] ss:$8 sps:$4 sm:$0xff]  }
  0x1e   : > { %v1755_v39 = vld [vmem:[%s1832_s9 + $0xe0] ss:$8 sps:$4 sm:$0xff]   ;;  %v1756_v40 = vld [vmem:[%s1832_s9 + $0x64] ss:$8 sps:$4 sm:$0xff]   ;;  %v1758_v41 = vld [vmem:[%s1832_s9 + $0xf4] ss:$8 sps:$4 sm:$0xff]  }
  0x1f   : > { %1515 = vmatpush3.bf16.msra.mxu0 %v1711_v7  ;;  %1691 = vmatpush3.bf16.msra.mxu1 %v1711_v7  ;;  %v1760_v42 = vld [vmem:[%s1832_s9 + $0x60] ss:$8 sps:$4 sm:$0xff]   ;;  %v1761_v43 = vld [vmem:[%s1832_s9 + $0xf0] ss:$8 sps:$4 sm:$0xff]   ;;  %v1762_v44 = vld [vmem:[%s1832_s9 + $0x74] ss:$8 sps:$4 sm:$0xff]  }
  0x20   : > { %1516 = vmatprep.subr.bf16.mxu0 %v1712_v8  ;;  %1684 = vmatprep.subr.bf16.mxu1 %v1712_v8  ;;  %v1764_v45 = vld [vmem:[%s1832_s9 + $0x70] ss:$8 sps:$4 sm:$0xff]   ;;  %v1765_v46 = vld [vmem:[%s1832_s9 + $0x84] ss:$8 sps:$4 sm:$0xff]   ;;  %v1767_v47 = vld [vmem:[%s1832_s9 + $0x80] ss:$8 sps:$4 sm:$0xff]  }
  0x21   : > { %p297_p5 = scmp.lt.s32.totalorder %s1444_s12, 31 }
  0x23   : > { %1517 = vmatpush3.bf16.msra.mxu0 %v1713_v9  ;;  %1692 = vmatpush3.bf16.msra.mxu1 %v1713_v9  ;;  %s2208_s12 = smov (!%p297_p5, %s1444_s12), 31 }
  0x24   : > { %1518 = vmatprep.subr.bf16.mxu0 %v1714_v10  ;;  %1685 = vmatprep.subr.bf16.mxu1 %v1714_v10  ;;  %s1445_s13 = sshll.u32 %s2208_s12, 3 }
  0x25   : > { %s300_s18 = scalar_lea.vmem %s2204_s7, %s1445_s13 }
  0x27   : > { %1519 = vmatpush3.bf16.msra.mxu0 %v1715_v13  ;;  %1693 = vmatpush3.bf16.msra.mxu1 %v1715_v13 }
  0x28   : > { %1520 = vmatprep.subr.bf16.mxu0 %v1716_v14  ;;  %1686 = vmatprep.subr.bf16.mxu1 %v1716_v14 }
  0x2b   : > { %1521 = vmatpush3.bf16.msra.mxu0 %v1717_v15  ;;  %1694 = vmatpush3.bf16.msra.mxu1 %v1717_v15 }
  0x2c   : > { %1522 = vmatprep.subr.bf16.mxu0 %v1718_v16  ;;  %1687 = vmatprep.subr.bf16.mxu1 %v1718_v16 }
  0x2f   : > { %1523 = vmatpush3.bf16.msra.mxu0 %v1719_v17  ;;  %1695 = vmatpush3.bf16.msra.mxu1 %v1719_v17 }
  0x30   : > { %1665 = vmatprep.subr.bf16.mxu1 %v1664_v50 }
  0x32   : > { %663 = vmatmul.mubr.bf16.vlgmr.msra.gmra.mrb[0].mxu0 %v1720_v18  ;;  %735 = vmatmul.mubr.bf16.vlgmr.msra.gmra.mrb[0].mxu1 %v1723_v19 }
  0x33   : > { %670 = vmatprep.mubr.bf16.mxu0 %v1726_v20  ;;  %742 = vmatprep.mubr.bf16.mxu1 %v1728_v21 }
  0x34   : > { %1667 = vmatpush3.bf16.msra.mxu1 %v1664_v50 }
  0x35   : > { %1669 = vmatprep.subr.bf16.mxu1 %v1668_v53 }
  0x38   : > { %1671 = vmatpush3.bf16.msra.mxu1 %v1668_v53 }
  0x39   : > { %1673 = vmatprep.subr.bf16.mxu1 %v1905_v56 }
  0x3a   : > { %671 = vmatmul.mubr.bf16.gmra.mrb[4].mxu0 %v1730_v22  ;;  %743 = vmatmul.mubr.bf16.gmra.mrb[4].mxu1 %v1731_v23 }
  0x3b   : > { %678 = vmatprep.mubr.bf16.mxu0 %v1732_v24  ;;  %750 = vmatprep.mubr.bf16.mxu1 %v1734_v25 }
  0x42   : > { %679 = vmatmul.mubr.bf16.gmra.mrb[8].mxu0 %v1736_v26  ;;  %751 = vmatmul.mubr.bf16.gmra.mrb[8].mxu1 %v1737_v27 }
  0x43   : > { %686 = vmatprep.mubr.bf16.mxu0 %v1738_v28  ;;  %758 = vmatprep.mubr.bf16.mxu1 %v1740_v29 }
  0x4a   : > { %687 = vmatmul.mubr.bf16.gmra.mrb[12].mxu0 %v1742_v30  ;;  %759 = vmatmul.mubr.bf16.gmra.mrb[12].mxu1 %v1743_v31 }
  0x4b   : > { %694 = vmatprep.mubr.bf16.mxu0 %v1744_v32  ;;  %766 = vmatprep.mubr.bf16.mxu1 %v1746_v33 }
  0x52   : > { %695 = vmatmul.mubr.bf16.gmra.mrb[16].mxu0 %v1748_v34  ;;  %767 = vmatmul.mubr.bf16.gmra.mrb[16].mxu1 %v1749_v35 }
  0x53   : > { %702 = vmatprep.mubr.bf16.mxu0 %v1750_v36  ;;  %774 = vmatprep.mubr.bf16.mxu1 %v1752_v37 }
  0x5a   : > { %703 = vmatmul.mubr.bf16.gmra.mrb[20].mxu0 %v1754_v38  ;;  %775 = vmatmul.mubr.bf16.gmra.mrb[20].mxu1 %v1755_v39 }
  0x5b   : > { %710 = vmatprep.mubr.bf16.mxu0 %v1756_v40  ;;  %782 = vmatprep.mubr.bf16.mxu1 %v1758_v41 }
  0x62   : > { %711 = vmatmul.mubr.bf16.gmra.mrb[24].mxu0 %v1760_v42  ;;  %783 = vmatmul.mubr.bf16.gmra.mrb[24].mxu1 %v1761_v43 }
  0x63   : > { %718 = vmatprep.mubr.bf16.mxu0 %v1762_v44 }
  0x6a   : > { %719 = vmatmul.mubr.bf16.gmra.mrb[28].mxu0 %v1764_v45 }
  0x6b   : > { %726 = vmatprep.mubr.bf16.mxu0 %v1765_v46 }
  0x72   : > { %727 = vmatmul.mubr.bf16.gmra.mrb[32].mxu0 %v1767_v47 }
 0x105   : > { %v1524_v57 = vpop.f32.mrb[0].mxu0  ;;  %v1578_v58 = vpop.f32.mrb[0].mxu1 }
 0x106   : > { %v1525_v60 = vpop.f32.mrb[1].mxu0  ;;  %v1579_v61 = vpop.f32.mrb[1].mxu1 }
 0x107   : > { %v1526_v62 = vadd.f32 %v1525_v60, %v1524_v57  ;;  %v1527_v63 = vpop.f32.mrb[2].mxu0  ;;  %v1580_v0 = vadd.f32 %v1579_v61, %v1578_v58  ;;  %v1581_v1 = vpop.f32.mrb[2].mxu1 }
 0x108   : > { %v1528_v2 = vpop.f32.mrb[3].mxu0  ;;  %v1582_v3 = vpop.f32.mrb[3].mxu1 }
 0x109   : > { %v665_v4 = vadd.f32 %v1526_v62, %v1911_v59  ;;  %v1529_v5 = vadd.f32 %v1528_v2, %v1527_v63  ;;  %v1583_v6 = vadd.f32 %v1582_v3, %v1581_v1  ;;  %v737_v9 = vadd.f32 %v1580_v0, %v1911_v59 }
 0x10b   : > { %v791_v7 = vmax.f32 %v665_v4, 0.0  ;;  %v668_v8 = vadd.f32 %v1529_v5, %v1911_v59  ;;  %v740_v16 = vadd.f32 %v1583_v6, %v1911_v59  ;;  %v809_v26 = vmax.f32 %v737_v9, 0.0 }
 0x10d   : > { %v824_v10 = vsel %vm823_vm0, %v791_v7, 0.0  ;;  %v792_v11 = vmax.f32 %v668_v8, 0.0  ;;  %v1530_v12 = vpop.f32.mrb[4].mxu0  ;;  %v1584_v13 = vpop.f32.mrb[4].mxu1  ;;  %v810_v33 = vmax.f32 %v740_v16, 0.0  ;;  %v950_v39 = vsel %vm823_vm0, %v809_v26, 0.0 }
 0x10e   : > { %v825_v14 = vrot.slane %v824_v10, 4  ;;  %v1531_v15 = vpop.f32.mrb[5].mxu0  ;;  %v1585_v17 = vpop.f32.mrb[5].mxu1  ;;  %v951_v51 = vrot.slane %v950_v39, 4 }
 0x10f   : > { %v831_v18 = vsel %vm823_vm0, %v792_v11, 0.0  ;;  %v1532_v19 = vadd.f32 %v1531_v15, %v1530_v12  ;;  %v1533_v20 = vpop.f32.mrb[6].mxu0  ;;  %v1586_v21 = vadd.f32 %v1585_v17, %v1584_v13  ;;  %v1587_v22 = vpop.f32.mrb[6].mxu1  ;;  %v957_v48 = vsel %vm823_vm0, %v810_v33, 0.0 }
 0x110   : > { %v826_v23 = vadd.f32 %v825_v14, %v824_v10  ;;  %v832_v24 = vrot.slane %v831_v18, 4  ;;  %v1534_v25 = vpop.f32.mrb[7].mxu0  ;;  %v1588_v27 = vpop.f32.mrb[7].mxu1  ;;  %v958_v1 = vrot.slane %v957_v48, 4  ;;  %v952_v11 = vadd.f32 %v951_v51, %v950_v39 }
 0x111   : > { %v673_v28 = vadd.f32 %v1532_v19, %v1911_v59  ;;  %v1535_v29 = vadd.f32 %v1534_v25, %v1533_v20  ;;  %v1589_v30 = vadd.f32 %v1588_v27, %v1587_v22  ;;  %v745_v36 = vadd.f32 %v1586_v21, %v1911_v59 }
 0x112   : > { %v827_v31 = vrot.slane %v826_v23, 2  ;;  %v833_v32 = vadd.f32 %v832_v24, %v831_v18  ;;  %v959_v14 = vadd.f32 %v958_v1, %v957_v48 }
 0x113   : > { %v793_v34 = vmax.f32 %v673_v28, 0.0  ;;  %v676_v35 = vadd.f32 %v1535_v29, %v1911_v59  ;;  %v811_v54 = vmax.f32 %v745_v36, 0.0  ;;  %v748_v5 = vadd.f32 %v1589_v30, %v1911_v59 }
 0x114   : > { %v828_v37 = vadd.f32 %v827_v31, %v826_v23  ;;  %v834_v38 = vrot.slane %v833_v32, 2  ;;  %v953_v30 = vrot.slane %v952_v11, 2 }
 0x115   : > { %v838_v40 = vsel %vm823_vm0, %v793_v34, 0.0  ;;  %v794_v41 = vmax.f32 %v676_v35, 0.0  ;;  %v1536_v42 = vpop.f32.mrb[8].mxu0  ;;  %v1924_v43 = vpop.f32.mrb[8].mxu1  ;;  %v964_v12 = vsel %vm823_vm0, %v811_v54, 0.0  ;;  %v812_v22 = vmax.f32 %v748_v5, 0.0 }
 0x116   : > { %v829_v44 = vrot.slane %v828_v37, 1  ;;  %v835_v45 = vadd.f32 %v834_v38, %v833_v32  ;;  %v839_v46 = vrot.slane %v838_v40, 4  ;;  %v1537_v47 = vpop.f32.mrb[9].mxu0  ;;  %v1927_v49 = vpop.f32.mrb[9].mxu1  ;;  %v965_v26 = vrot.slane %v964_v12, 4 }
 0x117   : > { %v845_v50 = vsel %vm823_vm0, %v794_v41, 0.0  ;;  %v1538_v52 = vadd.f32 %v1537_v47, %v1536_v42  ;;  %v1539_v53 = vpop.f32.mrb[10].mxu0  ;;  %v1930_v55 = vpop.f32.mrb[10].mxu1  ;;  %v960_v35 = vrot.slane %v959_v14, 2  ;;  %v971_v41 = vsel %vm823_vm0, %v812_v22, 0.0 }
 0x118   : > { %v830_v57 = vadd.f32 %v829_v44, %v828_v37  ;;  %v836_v58 = vrot.slane %v835_v45, 1  ;;  %v840_v60 = vadd.f32 %v839_v46, %v838_v40  ;;  %v846_v61 = vrot.slane %v845_v50, 4  ;;  %v1540_v62 = vpop.f32.mrb[11].mxu0  ;;  %v1932_v63 = vpop.f32.mrb[11].mxu1 }
 0x119   : > { %v681_v0 = vadd.f32 %v1538_v52, %v1911_v59  ;;  %v1541_v2 = vadd.f32 %v1540_v62, %v1539_v53  ;;  %v966_v44 = vadd.f32 %v965_v26, %v964_v12  ;;  %v1954_v47 = vadd.f32 %v953_v30, %v952_v11 }
 0x11a   : > { %v837_v3 = vadd.f32 %v836_v58, %v835_v45  ;;  %v847_v4 = vadd.f32 %v846_v61, %v845_v50  ;;  %v841_v6 = vrot.slane %v840_v60, 2  ;;  %v1048_v9 = vmul.f32 0.125, %v830_v57 }
 0x11b   : > { %v795_v7 = vmax.f32 %v681_v0, 0.0  ;;  %v684_v8 = vadd.f32 %v1541_v2, %v1911_v59  ;;  %v1592_v51 = vadd.f32 %v1927_v49, %v1924_v43  ;;  %v1958_v52 = vadd.f32 %v960_v35, %v959_v14 }
 0x11c   : > { %v1049_v10 = vmul.f32 0.125, %v837_v3  ;;  %v848_v19 = vrot.slane %v847_v4, 2  ;;  %v842_v24 = vadd.f32 %v841_v6, %v840_v60  ;;  %v972_v54 = vrot.slane %v971_v41, 4 }
 0x11d   : > { %v852_v13 = vsel %vm823_vm0, %v795_v7, 0.0  ;;  %v796_v15 = vmax.f32 %v684_v8, 0.0  ;;  %v1542_v16 = vpop.f32.mrb[12].mxu0  ;;  %v1939_v17 = vpop.f32.mrb[12].mxu1  ;;  %v753_v1 = vadd.f32 %v1592_v51, %v1911_v59  ;;  %v967_v5 = vrot.slane %v966_v44, 2 }
 0x11e   : > { %v1942_v18 = vsel %vm1123_vm1, %v1049_v10, %v1048_v9  ;;  %v853_v20 = vrot.slane %v852_v13, 4  ;;  %v1543_v21 = vpop.f32.mrb[13].mxu0  ;;  %v1944_v23 = vpop.f32.mrb[13].mxu1  ;;  %v849_v38 = vadd.f32 %v848_v19, %v847_v4  ;;  %v843_v42 = vrot.slane %v842_v24, 1 }
 0x11f   : > { %v859_v25 = vsel %vm823_vm0, %v796_v15, 0.0  ;;  %v1544_v27 = vadd.f32 %v1543_v21, %v1542_v16  ;;  %v1545_v28 = vpop.f32.mrb[14].mxu0  ;;  %v1947_v29 = vpop.f32.mrb[14].mxu1  ;;  %v1969_v14 = vadd.f32 %v972_v54, %v971_v41  ;;  %v1595_v16 = vadd.f32 %v1932_v63, %v1930_v55 }
 0x120   : > { %v854_v31 = vadd.f32 %v853_v20, %v852_v13  ;;  %v860_v32 = vrot.slane %v859_v25, 4  ;;  %v1546_v33 = vpop.f32.mrb[15].mxu0  ;;  %v1949_v34 = vpop.f32.mrb[15].mxu1  ;;  %v850_v61 = vrot.slane %v849_v38, 1  ;;  %v844_v4 = vadd.f32 %v843_v42, %v842_v24 }
 0x121   : > { %v689_v36 = vadd.f32 %v1544_v27, %v1911_v59  ;;  %v1547_v37 = vadd.f32 %v1546_v33, %v1545_v28  ;;  %v955_v20 = vrot.slane %v1954_v47, 1  ;;  %v813_v21 = vmax.f32 %v753_v1, 0.0 }
 0x122   : > { %v855_v39 = vrot.slane %v854_v31, 2  ;;  %v861_v40 = vadd.f32 %v860_v32, %v859_v25  ;;  %v851_v19 = vadd.f32 %v850_v61, %v849_v38  ;;  %v962_v22 = vrot.slane %v1958_v52, 1 }
 0x123   : > { %v797_v45 = vmax.f32 %v689_v36, 0.0  ;;  %v692_v46 = vadd.f32 %v1547_v37, %v1911_v59  ;;  %v1976_v24 = vadd.f32 %v967_v5, %v966_v44  ;;  %v1978_v27 = vmul.f32 0.125, %v844_v4 }
 0x124   : > { %v856_v48 = vadd.f32 %v855_v39, %v854_v31  ;;  %v862_v50 = vrot.slane %v861_v40, 2  ;;  %v974_v32 = vrot.slane %v1969_v14, 2  ;;  %v1598_v63 = vadd.f32 %v1944_v23, %v1939_v17 }
 0x125   : > { %v866_v53 = vsel %vm823_vm0, %v797_v45, 0.0  ;;  %v798_v57 = vmax.f32 %v692_v46, 0.0  ;;  %v1548_v58 = vpop.f32.mrb[16].mxu0  ;;  %v1961_v60 = vpop.f32.mrb[16].mxu1  ;;  %v1986_v37 = vmul.f32 0.125, %v851_v19  ;;  %v978_v38 = vsel %vm823_vm0, %v813_v21, 0.0 }
 0x126   : > { %v863_v62 = vadd.f32 %v862_v50, %v861_v40  ;;  %v867_v0 = vrot.slane %v866_v53, 4  ;;  %v1549_v2 = vpop.f32.mrb[17].mxu0  ;;  %v1603_v3 = vpop.f32.mrb[17].mxu1  ;;  %v857_v8 = vrot.slane %v856_v48, 1  ;;  %v756_v40 = vadd.f32 %v1595_v16, %v1911_v59 }
 0x127   : > { %v873_v43 = vsel %vm823_vm0, %v798_v57, 0.0  ;;  %v1550_v49 = vadd.f32 %v1549_v2, %v1548_v58  ;;  %v1551_v6 = vpop.f32.mrb[18].mxu0  ;;  %v1965_v7 = vpop.f32.mrb[18].mxu1  ;;  %v761_v46 = vadd.f32 %v1598_v63, %v1911_v59  ;;  %v1601_v17 = vadd.f32 %v1949_v34, %v1947_v29 }
 0x128   : > { %v864_v9 = vrot.slane %v863_v62, 1  ;;  %v868_v10 = vadd.f32 %v867_v0, %v866_v53  ;;  %v874_v11 = vrot.slane %v873_v43, 4  ;;  %v1552_v12 = vpop.f32.mrb[19].mxu0  ;;  %v1967_v13 = vpop.f32.mrb[19].mxu1  ;;  %v858_v28 = vadd.f32 %v857_v8, %v856_v48 }
 0x129   : > { %v697_v15 = vadd.f32 %v1550_v49, %v1911_v59  ;;  %v1553_v55 = vadd.f32 %v1552_v12, %v1551_v6  ;;  %v979_v61 = vrot.slane %v978_v38, 4  ;;  %v815_v0 = vmax.f32 %v761_v46, 0.0 }
 0x12a   : > { %v875_v25 = vadd.f32 %v874_v11, %v873_v43  ;;  %v865_v30 = vadd.f32 %v864_v9, %v863_v62  ;;  %v869_v31 = vrot.slane %v868_v10, 2  ;;  %v1998_v50 = vmul.f32 0.125, %v858_v28 }
 0x12b   : > { %v799_v26 = vmax.f32 %v697_v15, 0.0  ;;  %v700_v45 = vadd.f32 %v1553_v55, %v1911_v59  ;;  %v764_v1 = vadd.f32 %v1601_v17, %v1911_v59  ;;  %v814_v29 = vmax.f32 %v756_v40, 0.0 }
 0x12c   : > { %v876_v44 = vrot.slane %v875_v25, 2  ;;  %v2000_v51 = vmul.f32 0.125, %v865_v30  ;;  %v2002_v53 = vadd.f32 %v869_v31, %v868_v10  ;;  %v1604_v34 = vadd.f32 %v1603_v3, %v1961_v60 }
 0x12d   : > { %v880_v33 = vsel %vm823_vm0, %v799_v26, 0.0  ;;  %v1554_v35 = vpop.f32.mrb[20].mxu0  ;;  %v1984_v36 = vpop.f32.mrb[20].mxu1  ;;  %v800_v62 = vmax.f32 %v700_v45, 0.0  ;;  %v992_v49 = vsel %vm823_vm0, %v815_v0, 0.0  ;;  %v816_v6 = vmax.f32 %v764_v1, 0.0 }
 0x12e   : > { %v881_v39 = vrot.slane %v880_v33, 4  ;;  %v1555_v41 = vpop.f32.mrb[21].mxu0  ;;  %v1990_v42 = vpop.f32.mrb[21].mxu1  ;;  %v2008_v5 = vadd.f32 %v876_v44, %v875_v25  ;;  %v871_v8 = vrot.slane %v2002_v53, 1  ;;  %v993_v11 = vrot.slane %v992_v49, 4 }
 0x12f   : > { %v1557_v23 = vpop.f32.mrb[22].mxu0  ;;  %v1996_v48 = vpop.f32.mrb[22].mxu1  ;;  %v1556_v4 = vadd.f32 %v1555_v41, %v1554_v35  ;;  %v887_v43 = vsel %vm823_vm0, %v800_v62, 0.0  ;;  %v2013_v12 = vadd.f32 %v979_v61, %v978_v38  ;;  %v999_v15 = vsel %vm823_vm0, %v816_v6, 0.0 }
 0x130   : > { %v882_v54 = vadd.f32 %v881_v39, %v880_v33  ;;  %v1558_v57 = vpop.f32.mrb[23].mxu0  ;;  %v2004_v58 = vpop.f32.mrb[23].mxu1  ;;  %v888_v10 = vrot.slane %v887_v43, 4  ;;  %v769_v16 = vadd.f32 %v1604_v34, %v1911_v59  ;;  %v2023_v25 = vsel %vm823_vm0, %v814_v29, 0.0 }
 0x131   : > { %v705_v60 = vadd.f32 %v1556_v4, %v1911_v59  ;;  %v994_v28 = vadd.f32 %v993_v11, %v992_v49  ;;  %v878_v33 = vrot.slane %v2008_v5, 1  ;;  %v1000_v55 = vrot.slane %v999_v15, 4 }
 0x132   : > { %v883_v2 = vrot.slane %v882_v54, 2  ;;  %v889_v26 = vadd.f32 %v888_v10, %v887_v43  ;;  %v817_v63 = vmax.f32 %v769_v16, 0.0  ;;  %v1607_v45 = vadd.f32 %v1967_v13, %v1965_v7 }
 0x133   : > { %v801_v35 = vmax.f32 %v705_v60, 0.0  ;;  %v995_v44 = vrot.slane %v994_v28, 2  ;;  %v1001_v61 = vadd.f32 %v1000_v55, %v999_v15  ;;  %v1559_v7 = vadd.f32 %v1558_v57, %v1557_v23 }
 0x134   : > { %v884_v9 = vadd.f32 %v883_v2, %v882_v54  ;;  %v890_v41 = vrot.slane %v889_v26, 2  ;;  %v986_v54 = vrot.slane %v2023_v25, 4  ;;  %v1006_v62 = vsel %vm823_vm0, %v817_v63, 0.0 }
 0x135   : > { %v2018_v3 = vpop.f32.mrb[24].mxu0  ;;  %v2020_v19 = vpop.f32.mrb[24].mxu1  ;;  %v894_v0 = vsel %vm823_vm0, %v801_v35, 0.0  ;;  %v996_v29 = vadd.f32 %v995_v44, %v994_v28  ;;  %v1007_v34 = vrot.slane %v1006_v62, 4  ;;  %v1002_v4 = vrot.slane %v1001_v61, 2 }
 0x136   : > { %v885_v21 = vrot.slane %v884_v9, 1  ;;  %v2025_v30 = vpop.f32.mrb[25].mxu0  ;;  %v2027_v31 = vpop.f32.mrb[25].mxu1  ;;  %v891_v2 = vadd.f32 %v890_v41, %v889_v26  ;;  %v895_v43 = vrot.slane %v894_v0, 4  ;;  %v772_v49 = vadd.f32 %v1607_v45, %v1911_v59 }
 0x137   : > { %v2030_v38 = vpop.f32.mrb[26].mxu0  ;;  %v2032_v39 = vpop.f32.mrb[26].mxu1  ;;  %v997_v6 = vrot.slane %v996_v29, 1  ;;  %v1610_v10 = vadd.f32 %v1990_v42, %v1984_v36  ;;  %v1003_v11 = vadd.f32 %v1002_v4, %v1001_v61  ;;  %v708_v60 = vadd.f32 %v1559_v7, %v1911_v59 }
 0x138   : > { %v886_v40 = vadd.f32 %v885_v21, %v884_v9  ;;  %v2036_v46 = vpop.f32.mrb[27].mxu0  ;;  %v2038_v17 = vpop.f32.mrb[27].mxu1  ;;  %v892_v13 = vrot.slane %v891_v2, 1  ;;  %v1008_v9 = vadd.f32 %v1007_v34, %v1006_v62  ;;  %v896_v15 = vadd.f32 %v895_v43, %v894_v0 }
 0x139   : > { %v818_v16 = vmax.f32 %v772_v49, 0.0  ;;  %v998_v28 = vadd.f32 %v997_v6, %v996_v29  ;;  %v777_v63 = vadd.f32 %v1610_v10, %v1911_v59  ;;  %v1004_v23 = vrot.slane %v1003_v11, 1 }
 0x13a   : > { %v1056_v1 = vmul.f32 0.125, %v886_v40  ;;  %v893_v26 = vadd.f32 %v892_v13, %v891_v2  ;;  %v1009_v55 = vrot.slane %v1008_v9, 2  ;;  %v897_v57 = vrot.slane %v896_v15, 2 }
 0x13b   : > { %v1013_v40 = vsel %vm823_vm0, %v818_v16, 0.0  ;;  %v802_v41 = vmax.f32 %v708_v60, 0.0  ;;  %v1072_v44 = vmul.f32 0.125, %v998_v28  ;;  %v1005_v0 = vadd.f32 %v1004_v23, %v1003_v11 }
 0x13c   : > { %v1057_v42 = vmul.f32 0.125, %v893_v26  ;;  %v1010_v45 = vadd.f32 %v1009_v55, %v1008_v9  ;;  %v1014_v61 = vrot.slane %v1013_v40, 4  ;;  %v898_v2 = vadd.f32 %v897_v57, %v896_v15 }
 0x13d   : > { %v2047_v21 = vpop.f32.mrb[28].mxu0  ;;  %v901_v29 = vsel %vm823_vm0, %v802_v41, 0.0  ;;  %v819_v34 = vmax.f32 %v777_v63, 0.0  ;;  %v1073_v13 = vmul.f32 0.125, %v1005_v0  ;;  %v1613_v9 = vadd.f32 %v2004_v58, %v1996_v48 }
 0x13e   : > { %v2050_v35 = vpop.f32.mrb[29].mxu0  ;;  %v1137_v4 = vsel %vm1123_vm1, %v1057_v42, %v1056_v1  ;;  %v1011_v43 = vrot.slane %v1010_v45, 1  ;;  %v1015_v49 = vadd.f32 %v1014_v61, %v1013_v40  ;;  %v902_v7 = vrot.slane %v901_v29, 4 }
 0x13f   : > { %v2053_v36 = vpop.f32.mrb[30].mxu0  ;;  %v899_v6 = vrot.slane %v898_v2, 1  ;;  %v1020_v10 = vsel %vm823_vm0, %v819_v34, 0.0  ;;  %v2063_v16 = vadd.f32 %v986_v54, %v2023_v25  ;;  %v2066_v26 = vsel %vm1123_vm1, %v1073_v13, %v1072_v44 }
 0x140   : > { %v2055_v62 = vpop.f32.mrb[31].mxu0  ;;  %v1016_v11 = vrot.slane %v1015_v49, 2  ;;  %v903_v15 = vadd.f32 %v902_v7, %v901_v29  ;;  %v1021_v60 = vrot.slane %v1020_v10, 4  ;;  %v780_v28 = vadd.f32 %v1613_v9, %v1911_v59 }
 0x141   : > { %v900_v1 = vadd.f32 %v899_v6, %v898_v2  ;;  %v1562_v55 = vadd.f32 %v2025_v30, %v2018_v3  ;;  %v1012_v23 = vadd.f32 %v1011_v43, %v1010_v45  ;;  %v1616_v42 = vadd.f32 %v2027_v31, %v2020_v19 }
 0x142   : > { %v1017_v48 = vadd.f32 %v1016_v11, %v1015_v49  ;;  %v904_v58 = vrot.slane %v903_v15, 2  ;;  %v1022_v25 = vadd.f32 %v1021_v60, %v1020_v10  ;;  %v820_v40 = vmax.f32 %v780_v28, 0.0 }
 0x143   : > { %v1058_v57 = vmul.f32 0.125, %v900_v1  ;;  %v713_v41 = vadd.f32 %v1562_v55, %v1911_v59  ;;  %v872_v3 = vadd.f32 %v871_v8, %v2002_v53  ;;  %v785_v19 = vadd.f32 %v1616_v42, %v1911_v59 }
 0x144   : > { %v1018_v30 = vrot.slane %v1017_v48, 1  ;;  %v905_v45 = vadd.f32 %v904_v58, %v903_v15  ;;  %v1023_v61 = vrot.slane %v1022_v25, 2  ;;  %v1027_v29 = vsel %vm823_vm0, %v820_v40, 0.0 }
 0x145   : > { %v2071_v63 = vpop.f32.mrb[32].mxu0  ;;  %v1138_v2 = vsel %vm1125_vm2, %v1058_v57, %v1137_v4  ;;  %v803_v34 = vmax.f32 %v713_v41, 0.0  ;;  %v981_v31 = vrot.slane %v2013_v12, 2  ;;  %v988_v43 = vrot.slane %v2063_v16, 2 }
 0x146   : > { %v2073_v54 = vpop.f32.mrb[33].mxu0  ;;  %v906_v49 = vrot.slane %v905_v45, 1  ;;  %v1028_v53 = vrot.slane %v1027_v29, 4  ;;  %v2090_v8 = vmul.f32 0.125, %v1012_v23  ;;  %v821_v13 = vmax.f32 %v785_v19, 0.0 }
 0x147   : > { %v2078_v44 = vpop.f32.mrb[34].mxu0  ;;  %v908_v7 = vsel %vm823_vm0, %v803_v34, 0.0  ;;  %v879_v4 = vadd.f32 %v878_v33, %v2008_v5  ;;  %v1019_v6 = vadd.f32 %v1018_v30, %v1017_v48  ;;  %v1024_v9 = vadd.f32 %v1023_v61, %v1022_v25 }
 0x148   : > { %v2083_v0 = vpop.f32.mrb[35].mxu0  ;;  %v907_v10 = vadd.f32 %v906_v49, %v905_v45  ;;  %v1029_v11 = vadd.f32 %v1028_v53, %v1027_v29  ;;  %v909_v15 = vrot.slane %v908_v7, 4  ;;  %v1034_v60 = vsel %vm823_vm0, %v821_v13, 0.0 }
 0x149   : > { %v1126_v1 = vsel %vm1125_vm2, %v1978_v27, %v1942_v18  ;;  %v1565_v28 = vadd.f32 %v2036_v46, %v2030_v38  ;;  %v1035_v58 = vrot.slane %v1034_v60, 4  ;;  %v1054_v57 = vmul.f32 0.125, %v872_v3 }
 0x14a   : > { %v1059_v55 = vmul.f32 0.125, %v907_v10  ;;  %v1030_v23 = vrot.slane %v1029_v11, 2  ;;  %v910_v40 = vadd.f32 %v909_v15, %v908_v7  ;;  %v1128_v5 = vsel %vm1127_vm3, %v1986_v37, %v1126_v1 }
 0x14b   : > { %v716_v33 = vadd.f32 %v1565_v28, %v1911_v59  ;;  %v1619_v48 = vadd.f32 %v2038_v17, %v2032_v39  ;;  %v1025_v41 = vrot.slane %v1024_v9, 1  ;;  %v1036_v18 = vadd.f32 %v1035_v58, %v1034_v60 }
 0x14c   : > { %v1139_v25 = vsel %vm1127_vm3, %v1059_v55, %v1138_v2  ;;  %v1055_v27 = vmul.f32 0.125, %v879_v4  ;;  %v911_v42 = vrot.slane %v910_v40, 2  ;;  %v1130_v38 = vsel %vm1129_vm4, %v1998_v50, %v1128_v5 }
 0x14d   : > { %v804_v46 = vmax.f32 %v716_v33, 0.0  ;;  %v788_v3 = vadd.f32 %v1619_v48, %v1911_v59  ;;  %v1031_v30 = vadd.f32 %v1030_v23, %v1029_v11  ;;  %v1037_v45 = vrot.slane %v1036_v18, 2 }
 0x14e   : > { %v1132_v37 = vsel %vm1131_vm5, %v2000_v51, %v1130_v38  ;;  %v1568_v39 = vadd.f32 %v2050_v35, %v2047_v21  ;;  %v912_v17 = vadd.f32 %v911_v42, %v910_v40  ;;  %v1075_v34 = vmul.f32 0.125, %v1019_v6 }
 0x14f   : > { %v1134_v61 = vsel %vm1133_vm6, %v1054_v57, %v1132_v37  ;;  %v915_v2 = vsel %vm823_vm0, %v804_v46, 0.0  ;;  %v822_v29 = vmax.f32 %v788_v3, 0.0  ;;  %v1038_v19 = vadd.f32 %v1037_v45, %v1036_v18 }
 0x150   : > { %v1136_v50 = vsel %vm1135_vm7, %v1055_v27, %v1134_v61  ;;  %v916_v49 = vrot.slane %v915_v2, 4  ;;  %v913_v53 = vrot.slane %v912_v17, 1  ;;  %v721_v51 = vadd.f32 %v1568_v39, %v1911_v59 }
 0x151   : > { %1644 = vmatprep.mubr.msk.f32.mxu1 %vm823_vm0, %v1136_v50  ;;  %v1041_v7 = vsel %vm823_vm0, %v822_v29, 0.0  ;;  %v1571_v21 = vadd.f32 %v2055_v62, %v2053_v36  ;;  %v1026_v35 = vadd.f32 %v1025_v41, %v1024_v9  ;;  %v1032_v13 = vrot.slane %v1031_v30, 1 }
 0x152   : > { %v917_v4 = vadd.f32 %v916_v49, %v915_v2  ;;  %v1042_v10 = vrot.slane %v1041_v7, 4  ;;  %v914_v11 = vadd.f32 %v913_v53, %v912_v17  ;;  %v805_v6 = vmax.f32 %v721_v51, 0.0 }
 0x153   : > { %v724_v15 = vadd.f32 %v1571_v21, %v1911_v59  ;;  %v1574_v60 = vadd.f32 %v2073_v54, %v2071_v63  ;;  %v1039_v1 = vrot.slane %v1038_v19, 1  ;;  %v1577_v23 = vadd.f32 %v2083_v0, %v2078_v44 }
 0x154   : > { %v918_v28 = vrot.slane %v917_v4, 2  ;;  %v1043_v55 = vadd.f32 %v1042_v10, %v1041_v7  ;;  %v1060_v58 = vmul.f32 0.125, %v914_v11  ;;  %v922_v36 = vsel %vm823_vm0, %v805_v6, 0.0 }
 0x155   : > { %v806_v62 = vmax.f32 %v724_v15, 0.0  ;;  %v729_v9 = vadd.f32 %v1574_v60, %v1911_v59  ;;  %v923_v5 = vrot.slane %v922_v36, 4  ;;  %v732_v33 = vadd.f32 %v1577_v23, %v1911_v59 }
 0x156   : > { %v919_v57 = vadd.f32 %v918_v28, %v917_v4  ;;  %v1044_v40 = vrot.slane %v1043_v55, 2  ;;  %v1033_v48 = vadd.f32 %v1032_v13, %v1031_v30  ;;  %v1140_v41 = vsel %vm1129_vm4, %v1060_v58, %v1139_v25 }
 0x157   : > { %v929_v63 = vsel %vm823_vm0, %v806_v62, 0.0  ;;  %v807_v54 = vmax.f32 %v729_v9, 0.0  ;;  %v924_v44 = vadd.f32 %v923_v5, %v922_v36  ;;  %v1076_v42 = vmul.f32 0.125, %v1026_v35 }
 0x158   : > { %v920_v18 = vrot.slane %v919_v57, 1  ;;  %v1045_v27 = vadd.f32 %v1044_v40, %v1043_v55  ;;  %v930_v0 = vrot.slane %v929_v63, 4  ;;  %v1040_v38 = vadd.f32 %v1039_v1, %v1038_v19 }
 0x159   : > { %v936_v46 = vsel %vm823_vm0, %v807_v54, 0.0  ;;  %v808_v3 = vmax.f32 %v732_v33, 0.0  ;;  %v925_v39 = vrot.slane %v924_v44, 2  ;;  %v1077_v59 = vmul.f32 0.125, %v1033_v48 }
 0x15a   : > { %v921_v45 = vadd.f32 %v920_v18, %v919_v57  ;;  %v1046_v37 = vrot.slane %v1045_v27, 1  ;;  %v931_v17 = vadd.f32 %v930_v0, %v929_v63  ;;  %v937_v30 = vrot.slane %v936_v46, 4 }
 0x15b   : > { %v943_v61 = vsel %vm823_vm0, %v808_v3, 0.0  ;;  %v1152_v25 = vsel %vm1125_vm2, %v2090_v8, %v2066_v26  ;;  %v926_v29 = vadd.f32 %v925_v39, %v924_v44  ;;  %v1078_v7 = vmul.f32 0.125, %v1040_v38 }
 0x15c   : > { %v1061_v2 = vmul.f32 0.125, %v921_v45  ;;  %v932_v50 = vrot.slane %v931_v17, 2  ;;  %v944_v49 = vrot.slane %v943_v61, 4  ;;  %v938_v19 = vadd.f32 %v937_v30, %v936_v46  ;;  %v1258_v30 = vld [vmem:[%s2202_s5 + $0x18] sm:$0xff] }
 0x15d   : > { %v1047_v53 = vadd.f32 %v1046_v37, %v1045_v27  ;;  %v1153_v51 = vsel %vm1127_vm3, %v1075_v34, %v1152_v25  ;;  %v927_v21 = vrot.slane %v926_v29, 1  ;;  %v975_v10 = vadd.f32 %v974_v32, %v1969_v14  ;;  %v1495_v25 = vld [vmem:[%s2201_s4] ss:$0 sm:$0xff] }
 0x15e   : > { %v933_v35 = vadd.f32 %v932_v50, %v931_v17  ;;  %v945_v13 = vadd.f32 %v944_v49, %v943_v61  ;;  %v1141_v4 = vsel %vm1131_vm5, %v1061_v2, %v1140_v41  ;;  %v939_v11 = vrot.slane %v938_v19, 2 }
 0x15f   : > { %v1079_v26 = vmul.f32 0.125, %v1047_v53  ;;  %v1154_v8 = vsel %vm1129_vm4, %v1076_v42, %v1153_v51  ;;  %v928_v6 = vadd.f32 %v927_v21, %v926_v29  ;;  %v982_v34 = vadd.f32 %v981_v31, %v2013_v12 }
 0x160   : > { %v934_v15 = vrot.slane %v933_v35, 1  ;;  %v946_v60 = vrot.slane %v945_v13, 2  ;;  %v1155_v1 = vsel %vm1131_vm5, %v1077_v59, %v1154_v8  ;;  %v989_v28 = vadd.f32 %v988_v43, %v2063_v16  ;;  %v1257_v59 = vld [vmem:[%s2202_s5 + $0x10] sm:$0xff] }
 0x161   : > { %v940_v55 = vadd.f32 %v939_v11, %v938_v19  ;;  %v1156_v14 = vsel %vm1133_vm6, %v1078_v7, %v1155_v1  ;;  %v1062_v32 = vmul.f32 0.125, %v928_v6  ;;  %v969_v62 = vrot.slane %v1976_v24, 1 }
 0x162   : > { %v935_v23 = vadd.f32 %v934_v15, %v933_v35  ;;  %v947_v58 = vadd.f32 %v946_v60, %v945_v13  ;;  %v1157_v36 = vsel %vm1135_vm7, %v1079_v26, %v1156_v14  ;;  %v976_v57 = vrot.slane %v975_v10, 1 }
 0x163   : > { %v941_v9 = vrot.slane %v940_v55, 1  ;;  %v1142_v12 = vsel %vm1133_vm6, %v1062_v32, %v1141_v4  ;;  %v956_v16 = vadd.f32 %v955_v20, %v1954_v47  ;;  %v983_v31 = vrot.slane %v982_v34, 1 }
 0x164   : > { %v1063_v40 = vmul.f32 0.125, %v935_v23  ;;  %v948_v5 = vrot.slane %v947_v58, 1  ;;  %v963_v33 = vadd.f32 %v962_v22, %v1958_v52  ;;  %v990_v48 = vrot.slane %v989_v28, 1 }
 0x165   : > { %v942_v43 = vadd.f32 %v941_v9, %v940_v55  ;;  %v970_v41 = vadd.f32 %v969_v62, %v1976_v24  ;;  %v977_v18 = vadd.f32 %v976_v57, %v975_v10  ;;  %v1066_v47 = vmul.f32 0.125, %v956_v16  ;;  %v1500_v10 = vld [vmem:[%s2203_s6] ss:$0 sm:$0xff] }
 0x166   : > { %v949_v63 = vadd.f32 %v948_v5, %v947_v58  ;;  %v1143_v54 = vsel %vm1135_vm7, %v1063_v40, %v1142_v12  ;;  %v984_v20 = vadd.f32 %v983_v31, %v982_v34  ;;  %v1067_v0 = vmul.f32 0.125, %v963_v33 }
 0x167   : > { %1645 = vmatmul.mubr.msk.f32.vlgmr.msra.gmra.mrb[28].mxu1 %vm823_vm0, %v1143_v54  ;;  %v1064_v27 = vmul.f32 0.125, %v942_v43  ;;  %v991_v38 = vadd.f32 %v990_v48, %v989_v28  ;;  %v1068_v52 = vmul.f32 0.125, %v970_v41  ;;  %v1069_v46 = vmul.f32 0.125, %v977_v18 }
 0x168   : > { %v1065_v44 = vmul.f32 0.125, %v949_v63  ;;  %1675 = vmatpush3.bf16.msra.mxu1 %v1905_v56  ;;  %v1070_v24 = vmul.f32 0.125, %v984_v20  ;;  %v1676_v61 = vpack.c.bf16 %v1258_v30, %v1257_v59 }
 0x169   : > { %v1071_v37 = vmul.f32 0.125, %v991_v38 }
 0x16a   : > { %v1144_v42 = vsel %vm1123_vm1, %v1065_v44, %v1064_v27  ;;  %1677 = vmatprep.subr.bf16.mxu1 %v1676_v61 }
 0x16b   : > { %v1145_v22 = vsel %vm1125_vm2, %v1066_v47, %v1144_v42 }
 0x16c   : > { %v1146_v3 = vsel %vm1127_vm3, %v1067_v0, %v1145_v22  ;;  %1679 = vmatpush3.bf16.msra.mxu1 %v1676_v61 }
 0x16d   : > { %v1147_v45 = vsel %vm1129_vm4, %v1068_v52, %v1146_v3 }
 0x16e   : > { %v1148_v39 = vsel %vm1131_vm5, %v1069_v46, %v1147_v45 }
 0x16f   : > { %v1149_v56 = vsel %vm1133_vm6, %v1070_v24, %v1148_v39 }
 0x170   : > { %v1150_v17 = vsel %vm1135_vm7, %v1071_v37, %v1149_v56 }
 0x171   : > { %1647 = vmatprep.mubr.msk.f32.mxu1 %vm823_vm0, %v1150_v17 }
 0x172   : > { %1648 = vmatmul.mubr.msk.f32.gmra.mrb[30].mxu1 %vm823_vm0, %v1157_v36 }
 0x23a   : > { %v1646_v2 = vpop.f32.mrb[28].mxu1 }
 0x23b   : > { %v1238_v29 = vadd.f32 %v1646_v2, %v1495_v25  ;;  %v1232_v50 = vpop.f32.mrb[29].mxu1 }
 0x23c   : > { %v1233_v49 = vadd.f32 %v1495_v25, %v1232_v50 }
 0x23d   : > { %v1252_v53 = vmax.f32 %v1238_v29, 0.0 }
 0x23e   : > { %v1251_v19 = vmax.f32 %v1233_v49, 0.0 }
 0x240   : > { %1658 = vmatprep.mubr.msk.f32.mxu1 %vm823_vm0, %v1251_v19 }
 0x241   : > { %1659 = vmatmul.mubr.msk.f32.vlgmr.msra.gmra.mrb[32].mxu1 %vm823_vm0, %v1252_v53 }
 0x245   : > { %v1649_v7 = vpop.f32.mrb[30].mxu1 }
 0x246   : > { %v1248_v51 = vadd.f32 %v1649_v7, %v1495_v25  ;;  %v1242_v21 = vpop.f32.mrb[31].mxu1 }
 0x247   : > { %v1243_v35 = vadd.f32 %v1495_v25, %v1242_v21 }
 0x248   : > { %v1254_v4 = vmax.f32 %v1248_v51, 0.0 }
 0x249   : > { %v1253_v13 = vmax.f32 %v1243_v35, 0.0 }
 0x24b   : > { %1661 = vmatprep.mubr.msk.f32.mxu1 %vm823_vm0, %v1253_v13 }
 0x24c   : > { %1662 = vmatmul.mubr.msk.f32.gmra.mrb[34].mxu1 %vm823_vm0, %v1254_v4 }
 0x314   : > { %v1660_v11 = vpop.f32.mrb[32].mxu1 }
 0x315   : > { %v1350_v26 = vadd.f32 %v1660_v11, %v1500_v10  ;;  %v1344_v8 = vpop.f32.mrb[33].mxu1 }
 0x316   : > { %v1345_v6 = vadd.f32 %v1500_v10, %v1344_v8 }
 0x317   : > { %1364 = vst [vmem:[%s300_s18 + $0x8] sm:$0xff] %v1350_v26 }
 0x318   : > { %1363 = vst [vmem:[%s300_s18] sm:$0xff] %v1345_v6 }
 0x31f   : > { %v1663_v15 = vpop.f32.mrb[34].mxu1 }
 0x320   : > { %v1360_v60 = vadd.f32 %v1663_v15, %v1500_v10  ;;  %v1354_v1 = vpop.f32.mrb[35].mxu1 }
 0x321   : > { %v1355_v34 = vadd.f32 %v1500_v10, %v1354_v1 }
 0x322   : > { %1366 = vst [vmem:[%s300_s18 + $0x18] sm:$0xff] %v1360_v60 }
 0x323   : > { %1365 = vst [vmem:[%s300_s18 + $0x10] sm:$0xff] %v1355_v34 }
 0x324 PF: > { %s17_s24 = sadd.s32 1, %s1774_s24  }
 0x325   : > { %p14_p6 = scmp.ge.s32.totalorder %s17_s24, 10  }
 0x327   :  { %16 = sbr.rel (!%p14_p6) target bundleno = 1 (0x1), region = 81 }

</bundles_post_ra>
